<compile_context>
chip_gen: v7x
topology: tpu7x:2x2x1
jax: 0.10.0
libtpu: 0.0.40
codegen_flags: <defaults>
</compile_context>

<pallas_src>
import jax
import jax.numpy as jnp
from jax.experimental import pallas as pl
from jax.experimental.pallas import tpu as pltpu


def _banded_conv_weights(w_oihw, w_in, w_out, offset):
    """Pack a 3x3 conv weight (OIHW) into 3 banded matrices, one per kernel row kh.

    A[kh] has shape (w_in*Cin, w_out*Cout) and maps a flattened input row
    (lane index = w*Cin + i) to a flattened output row (lane index = w*Cout + o).
    Entry (w_i*Cin + i, w_o*Cout + o) = w[o, i, kh, kw] when w_i == w_o + kw - offset
    (and is zero otherwise), so out-of-range taps — i.e. SAME padding when the input
    row is unpadded (offset=1) — are handled for free by the matmul.
    """
    Cout, Cin, KH, KW = w_oihw.shape
    a = jnp.zeros((KH, w_in * Cin, w_out * Cout), w_oihw.dtype)
    wi = jnp.arange(w_in)[:, None]
    wo = jnp.arange(w_out)[None, :]
    for kh in range(KH):
        for kw in range(KW):
            blk = w_oihw[:, :, kh, kw].T                        # (Cin, Cout)
            sel = (wi == wo + kw - offset).astype(w_oihw.dtype)  # (w_in, w_out) shifted eye
            band = jnp.einsum("wv,io->wivo", sel, blk)           # (w_in, Cin, w_out, Cout)
            a = a.at[kh].add(band.reshape(w_in * Cin, w_out * Cout))
    return a


def double_conv_kernel(x_ref, a1_ref, bb1_ref, a2_ref, bb2_ref, o_ref, ypad_ref):
    # x_ref   : (1, H+2, (W+2)*Cin)       spatially padded input rows, width*chan on lanes
    # a1_ref  : (3, (W+2)*Cin, W*Cout)    banded conv1 weights (one matrix per kh)
    # bb1_ref : (1, W*Cout) f32           conv1 bias, tiled over width
    # a2_ref  : (3, W*Cout, W*Cout)       banded conv2 weights (width padding baked in)
    # bb2_ref : (1, W*Cout) f32           conv2 bias, tiled over width
    # o_ref   : (1, H, W*Cout)            lane-dense output rows (exactly 128 lanes here)
    # ypad_ref: (H+2, W*Cout)             scratch: conv1 result + top/bottom zero halo rows
    _, H, wc = o_ref.shape

    # ---- conv1: 3 banded matmuls (K = (W+2)*Cin), f32 accumulation, no activation ----
    acc = jnp.zeros((H, wc), jnp.float32)
    for kh in range(3):                                # static unroll, 3 iterations
        acc += jnp.dot(x_ref[0, kh:kh + H, :], a1_ref[kh],
                       preferred_element_type=jnp.float32)
    acc += bb1_ref[...]

    # Stage intermediate in VMEM (MXU operand dtype: bf16 path casts once, here).
    # Only the two halo rows need zeros; re-written every grid step (2 tiny row stores)
    # so it stays correct under megacore grid partitioning.
    zrow = jnp.zeros((1, wc), ypad_ref.dtype)
    ypad_ref[0:1, :] = zrow
    ypad_ref[H + 1:H + 2, :] = zrow
    ypad_ref[1:H + 1, :] = acc.astype(ypad_ref.dtype)

    # ---- conv2: 3 banded matmuls (K = W*Cout = 128), no activation ----
    acc2 = jnp.zeros((H, wc), jnp.float32)
    for kh in range(3):
        acc2 += jnp.dot(ypad_ref[kh:kh + H, :], a2_ref[kh],
                        preferred_element_type=jnp.float32)
    acc2 += bb2_ref[...]

    o_ref[0] = acc2.astype(o_ref.dtype)                # full-lane-width, unmasked store


def double_conv(x_nchw, w1, b1, w2, b2, *, mxu_dtype=jnp.float32):
    """x_nchw: (N, Cin, H, W); w*: PyTorch OIHW conv weights; b*: (Cout,).

    mxu_dtype=jnp.bfloat16 feeds bf16 operands to the MXU (recommended on v6e/v7x);
    accumulation is always f32.
    """
    N, Cin, H, W = x_nchw.shape
    Cout = w1.shape[0]
    Wp = W + 2

    # Host-side glue: NCHW -> NHWC, spatial zero-pad, flatten (W+2, Cin) onto lanes.
    x_nhwc = jnp.transpose(x_nchw, (0, 2, 3, 1))
    x_pad = jnp.pad(x_nhwc, ((0, 0), (1, 1), (1, 1), (0, 0)))
    x_rows = x_pad.reshape(N, H + 2, Wp * Cin).astype(mxu_dtype)

    # Banded weights: conv1 consumes pre-padded rows (offset=0) and emits unpadded rows;
    # conv2 consumes unpadded rows with SAME-padding baked into the band (offset=1).
    a1 = _banded_conv_weights(w1, Wp, W, offset=0).astype(mxu_dtype)   # (3, Wp*Cin,  W*Cout)
    a2 = _banded_conv_weights(w2, W, W, offset=1).astype(mxu_dtype)    # (3, W*Cout,  W*Cout)
    bb1 = jnp.tile(b1.astype(jnp.float32), W).reshape(1, W * Cout)
    bb2 = jnp.tile(b2.astype(jnp.float32), W).reshape(1, W * Cout)

    itm = jnp.dtype(mxu_dtype).itemsize
    flops = 2 * N * H * 3 * (Wp * Cin * W * Cout + W * Cout * W * Cout)
    bytes_accessed = (
        N * (H + 2) * Wp * Cin * itm                          # input rows
        + 3 * Wp * Cin * W * Cout * itm                       # a1
        + 3 * W * Cout * W * Cout * itm                       # a2
        + 2 * W * Cout * 4                                    # biases
        + N * H * W * Cout * jnp.dtype(x_nchw.dtype).itemsize  # output
    )

    # NOTE: for large H/W (or v7x's 64 MiB VMEM) add an H-row-block grid axis with a
    # 2-row halo and set vmem_limit_bytes; at these shapes whole-image blocks are tiny.
    out_rows = pl.pallas_call(
        double_conv_kernel,
        out_shape=jax.ShapeDtypeStruct((N, H, W * Cout), x_nchw.dtype),
        grid=(N,),
        in_specs=[
            pl.BlockSpec((1, H + 2, Wp * Cin), lambda n: (n, 0, 0)),
            pl.BlockSpec((3, Wp * Cin, W * Cout), lambda n: (0, 0, 0)),
            pl.BlockSpec((1, W * Cout), lambda n: (0, 0)),
            pl.BlockSpec((3, W * Cout, W * Cout), lambda n: (0, 0, 0)),
            pl.BlockSpec((1, W * Cout), lambda n: (0, 0)),
        ],
        out_specs=pl.BlockSpec((1, H, W * Cout), lambda n: (n, 0, 0)),
        scratch_shapes=[pltpu.VMEM((H + 2, W * Cout), mxu_dtype)],
        compiler_params=pltpu.CompilerParams(dimension_semantics=("parallel",)),
        cost_estimate=pl.CostEstimate(flops=flops, transcendentals=0,
                                      bytes_accessed=bytes_accessed),
    )(x_rows, a1, bb1, a2, bb2)

    out = out_rows.reshape(N, H, W, Cout)
    return jnp.transpose(out, (0, 3, 1, 2))                   # back to NCHW


def ref_double_conv(x, w1, b1, w2, b2):
    """Pure-JAX reference matching the PyTorch module: conv -> conv, NO activation."""
    dn = ("NCHW", "OIHW", "NCHW")
    y = jax.lax.conv_general_dilated(x, w1, (1, 1), "SAME", dimension_numbers=dn)
    y = y + b1[None, :, None, None]
    y = jax.lax.conv_general_dilated(y, w2, (1, 1), "SAME", dimension_numbers=dn)
    return y + b2[None, :, None, None]


if __name__ == "__main__":
    N, Cin, Cout, H, W = 2, 4, 8, 16, 16

    key = jax.random.PRNGKey(0)
    kx, kw1, kb1, kw2, kb2 = jax.random.split(key, 5)

    x = jax.random.normal(kx, (N, Cin, H, W), dtype=jnp.float32)
    # Deterministic synthetic parameters (shapes per nn.Conv2d(in, out, 3, padding=1)).
    w1 = 0.1 * jax.random.normal(kw1, (Cout, Cin, 3, 3), dtype=jnp.float32)
    b1 = 0.1 * jax.random.normal(kb1, (Cout,), dtype=jnp.float32)
    w2 = 0.1 * jax.random.normal(kw2, (Cout, Cout, 3, 3), dtype=jnp.float32)
    b2 = 0.1 * jax.random.normal(kb2, (Cout,), dtype=jnp.float32)

    ref = jax.block_until_ready(ref_double_conv(x, w1, b1, w2, b2))

    # f32 MXU path: parity with the f32 PyTorch module.
    out = jax.block_until_ready(double_conv(x, w1, b1, w2, b2))
    assert out.shape == (N, Cout, H, W), out.shape
    assert jnp.allclose(out, ref, atol=1e-4, rtol=1e-4), float(jnp.max(jnp.abs(out - ref)))

    # bf16 MXU operand path (what you'd run on v6e/v7x); looser tolerance from bf16 rounding.
    out_bf16 = jax.block_until_ready(double_conv(x, w1, b1, w2, b2, mxu_dtype=jnp.bfloat16))
    assert jnp.allclose(out_bf16, ref, atol=1e-1, rtol=1e-1), \
        float(jnp.max(jnp.abs(out_bf16 - ref)))

    print("KERNEL_OK")
</pallas_src>

<mosaic_0001>
module attributes {stable_mosaic.version = 11 : i64} {
  func.func @double_conv_kernel(%arg0: i32, %arg1: memref<1x18x72xf32, #tpu.memory_space<vmem>>, %arg2: memref<3x72x128xf32, #tpu.memory_space<vmem>>, %arg3: memref<1x128xf32, #tpu.memory_space<vmem>>, %arg4: memref<3x128x128xf32, #tpu.memory_space<vmem>>, %arg5: memref<1x128xf32, #tpu.memory_space<vmem>>, %arg6: memref<1x16x128xf32, #tpu.memory_space<vmem>>, %arg7: memref<18x128xf32, #tpu.memory_space<vmem>>) attributes {dimension_semantics = [#tpu.dimension_semantics<parallel>], iteration_bounds = array<i64: 2>, scalar_prefetch = 0 : i64, scratch_operands = 1 : i64, tpu.core_type = #tpu.core_type<tc>, window_params = [{transform_indices = @transform_0, window_bounds = array<i64: 1, 18, 72>}, {pipeline_mode = #tpu.pipeline_mode<synchronous>, transform_indices = @transform_1, window_bounds = array<i64: 3, 72, 128>}, {pipeline_mode = #tpu.pipeline_mode<synchronous>, transform_indices = @transform_2, window_bounds = array<i64: 1, 128>}, {pipeline_mode = #tpu.pipeline_mode<synchronous>, transform_indices = @transform_3, window_bounds = array<i64: 3, 128, 128>}, {pipeline_mode = #tpu.pipeline_mode<synchronous>, transform_indices = @transform_4, window_bounds = array<i64: 1, 128>}, {transform_indices = @transform_5, window_bounds = array<i64: 1, 16, 128>}]} {
    %cst = arith.constant 0.000000e+00 : f32
    %0 = vector.broadcast %cst : f32 to vector<16x128xf32>
    %c0 = arith.constant 0 : index
    %c0_0 = arith.constant 0 : index
    %c0_1 = arith.constant 0 : index
    %1 = vector.load %arg1[%c0, %c0_0, %c0_1] : memref<1x18x72xf32, #tpu.memory_space<vmem>>, vector<1x16x72xf32>
    %2 = vector.shape_cast %1 : vector<1x16x72xf32> to vector<16x72xf32>
    %c0_2 = arith.constant 0 : index
    %c0_3 = arith.constant 0 : index
    %c0_4 = arith.constant 0 : index
    %3 = vector.load %arg2[%c0_2, %c0_3, %c0_4] : memref<3x72x128xf32, #tpu.memory_space<vmem>>, vector<1x72x128xf32>
    %4 = vector.shape_cast %3 : vector<1x72x128xf32> to vector<72x128xf32>
    %cst_5 = arith.constant dense<0.000000e+00> : vector<16x128xf32>
    %5 = tpu.matmul %2, %4, %cst_5 {dimension_numbers = #tpu.dot_dimension_numbers<[1], [0], [0], [1], [0, 0, 1, 1], [], []>} : vector<16x72xf32>, vector<72x128xf32>, vector<16x128xf32> -> vector<16x128xf32>
    %6 = arith.addf %0, %5 : vector<16x128xf32>
    %c0_6 = arith.constant 0 : index
    %c1 = arith.constant 1 : index
    %c0_7 = arith.constant 0 : index
    %7 = vector.load %arg1[%c0_6, %c1, %c0_7] : memref<1x18x72xf32, #tpu.memory_space<vmem>>, vector<1x16x72xf32>
    %8 = vector.shape_cast %7 : vector<1x16x72xf32> to vector<16x72xf32>
    %c1_8 = arith.constant 1 : index
    %c0_9 = arith.constant 0 : index
    %c0_10 = arith.constant 0 : index
    %9 = vector.load %arg2[%c1_8, %c0_9, %c0_10] : memref<3x72x128xf32, #tpu.memory_space<vmem>>, vector<1x72x128xf32>
    %10 = vector.shape_cast %9 : vector<1x72x128xf32> to vector<72x128xf32>
    %cst_11 = arith.constant dense<0.000000e+00> : vector<16x128xf32>
    %11 = tpu.matmul %8, %10, %cst_11 {dimension_numbers = #tpu.dot_dimension_numbers<[1], [0], [0], [1], [0, 0, 1, 1], [], []>} : vector<16x72xf32>, vector<72x128xf32>, vector<16x128xf32> -> vector<16x128xf32>
    %12 = arith.addf %6, %11 : vector<16x128xf32>
    %c0_12 = arith.constant 0 : index
    %c2 = arith.constant 2 : index
    %c0_13 = arith.constant 0 : index
    %13 = vector.load %arg1[%c0_12, %c2, %c0_13] : memref<1x18x72xf32, #tpu.memory_space<vmem>>, vector<1x16x72xf32>
    %14 = vector.shape_cast %13 : vector<1x16x72xf32> to vector<16x72xf32>
    %c2_14 = arith.constant 2 : index
    %c0_15 = arith.constant 0 : index
    %c0_16 = arith.constant 0 : index
    %15 = vector.load %arg2[%c2_14, %c0_15, %c0_16] : memref<3x72x128xf32, #tpu.memory_space<vmem>>, vector<1x72x128xf32>
    %16 = vector.shape_cast %15 : vector<1x72x128xf32> to vector<72x128xf32>
    %cst_17 = arith.constant dense<0.000000e+00> : vector<16x128xf32>
    %17 = tpu.matmul %14, %16, %cst_17 {dimension_numbers = #tpu.dot_dimension_numbers<[1], [0], [0], [1], [0, 0, 1, 1], [], []>} : vector<16x72xf32>, vector<72x128xf32>, vector<16x128xf32> -> vector<16x128xf32>
    %18 = arith.addf %12, %17 : vector<16x128xf32>
    %c0_18 = arith.constant 0 : index
    %c0_19 = arith.constant 0 : index
    %19 = vector.load %arg3[%c0_18, %c0_19] : memref<1x128xf32, #tpu.memory_space<vmem>>, vector<1x128xf32>
    %20 = vector.broadcast %19 : vector<1x128xf32> to vector<16x128xf32>
    %21 = arith.addf %18, %20 : vector<16x128xf32>
    %cst_20 = arith.constant 0.000000e+00 : f32
    %22 = vector.broadcast %cst_20 : f32 to vector<1x128xf32>
    %c0_21 = arith.constant 0 : index
    %c0_22 = arith.constant 0 : index
    %23 = vector.load %arg7[%c0_21, %c0_22] : memref<18x128xf32, #tpu.memory_space<vmem>>, vector<1x128xf32>
    tpu.vector_store %arg7[%c0_21, %c0_22], %22 {strides = array<i32>} : memref<18x128xf32, #tpu.memory_space<vmem>>, vector<1x128xf32>,
    %c17 = arith.constant 17 : index
    %c0_23 = arith.constant 0 : index
    %24 = vector.load %arg7[%c17, %c0_23] : memref<18x128xf32, #tpu.memory_space<vmem>>, vector<1x128xf32>
    tpu.vector_store %arg7[%c17, %c0_23], %22 {strides = array<i32>} : memref<18x128xf32, #tpu.memory_space<vmem>>, vector<1x128xf32>,
    %c1_24 = arith.constant 1 : index
    %c0_25 = arith.constant 0 : index
    %25 = vector.load %arg7[%c1_24, %c0_25] : memref<18x128xf32, #tpu.memory_space<vmem>>, vector<16x128xf32>
    tpu.vector_store %arg7[%c1_24, %c0_25], %21 {strides = array<i32>} : memref<18x128xf32, #tpu.memory_space<vmem>>, vector<16x128xf32>,
    %cst_26 = arith.constant 0.000000e+00 : f32
    %26 = vector.broadcast %cst_26 : f32 to vector<16x128xf32>
    %c0_27 = arith.constant 0 : index
    %c0_28 = arith.constant 0 : index
    %27 = vector.load %arg7[%c0_27, %c0_28] : memref<18x128xf32, #tpu.memory_space<vmem>>, vector<16x128xf32>
    %c0_29 = arith.constant 0 : index
    %c0_30 = arith.constant 0 : index
    %c0_31 = arith.constant 0 : index
    %28 = vector.load %arg4[%c0_29, %c0_30, %c0_31] : memref<3x128x128xf32, #tpu.memory_space<vmem>>, vector<1x128x128xf32>
    %29 = vector.shape_cast %28 : vector<1x128x128xf32> to vector<128x128xf32>
    %cst_32 = arith.constant dense<0.000000e+00> : vector<16x128xf32>
    %30 = tpu.matmul %27, %29, %cst_32 {dimension_numbers = #tpu.dot_dimension_numbers<[1], [0], [0], [1], [0, 0, 1, 1], [], []>} : vector<16x128xf32>, vector<128x128xf32>, vector<16x128xf32> -> vector<16x128xf32>
    %31 = arith.addf %26, %30 : vector<16x128xf32>
    %c1_33 = arith.constant 1 : index
    %c0_34 = arith.constant 0 : index
    %32 = vector.load %arg7[%c1_33, %c0_34] : memref<18x128xf32, #tpu.memory_space<vmem>>, vector<16x128xf32>
    %c1_35 = arith.constant 1 : index
    %c0_36 = arith.constant 0 : index
    %c0_37 = arith.constant 0 : index
    %33 = vector.load %arg4[%c1_35, %c0_36, %c0_37] : memref<3x128x128xf32, #tpu.memory_space<vmem>>, vector<1x128x128xf32>
    %34 = vector.shape_cast %33 : vector<1x128x128xf32> to vector<128x128xf32>
    %cst_38 = arith.constant dense<0.000000e+00> : vector<16x128xf32>
    %35 = tpu.matmul %32, %34, %cst_38 {dimension_numbers = #tpu.dot_dimension_numbers<[1], [0], [0], [1], [0, 0, 1, 1], [], []>} : vector<16x128xf32>, vector<128x128xf32>, vector<16x128xf32> -> vector<16x128xf32>
    %36 = arith.addf %31, %35 : vector<16x128xf32>
    %c2_39 = arith.constant 2 : index
    %c0_40 = arith.constant 0 : index
    %37 = vector.load %arg7[%c2_39, %c0_40] : memref<18x128xf32, #tpu.memory_space<vmem>>, vector<16x128xf32>
    %c2_41 = arith.constant 2 : index
    %c0_42 = arith.constant 0 : index
    %c0_43 = arith.constant 0 : index
    %38 = vector.load %arg4[%c2_41, %c0_42, %c0_43] : memref<3x128x128xf32, #tpu.memory_space<vmem>>, vector<1x128x128xf32>
    %39 = vector.shape_cast %38 : vector<1x128x128xf32> to vector<128x128xf32>
    %cst_44 = arith.constant dense<0.000000e+00> : vector<16x128xf32>
    %40 = tpu.matmul %37, %39, %cst_44 {dimension_numbers = #tpu.dot_dimension_numbers<[1], [0], [0], [1], [0, 0, 1, 1], [], []>} : vector<16x128xf32>, vector<128x128xf32>, vector<16x128xf32> -> vector<16x128xf32>
    %41 = arith.addf %36, %40 : vector<16x128xf32>
    %c0_45 = arith.constant 0 : index
    %c0_46 = arith.constant 0 : index
    %42 = vector.load %arg5[%c0_45, %c0_46] : memref<1x128xf32, #tpu.memory_space<vmem>>, vector<1x128xf32>
    %43 = vector.broadcast %42 : vector<1x128xf32> to vector<16x128xf32>
    %44 = arith.addf %41, %43 : vector<16x128xf32>
    %c0_47 = arith.constant 0 : index
    %c0_48 = arith.constant 0 : index
    %c0_49 = arith.constant 0 : index
    %45 = vector.load %arg6[%c0_47, %c0_48, %c0_49] : memref<1x16x128xf32, #tpu.memory_space<vmem>>, vector<1x16x128xf32>
    %46 = vector.shape_cast %45 : vector<1x16x128xf32> to vector<16x128xf32>
    %47 = vector.shape_cast %44 : vector<16x128xf32> to vector<1x16x128xf32>
    tpu.vector_store %arg6[%c0_47, %c0_48, %c0_49], %47 {strides = array<i32>} : memref<1x16x128xf32, #tpu.memory_space<vmem>>, vector<1x16x128xf32>,
    return
  }
  func.func @transform_0(%arg0: i32) -> (i32, i32, i32) {
    %c0_i32 = arith.constant 0 : i32
    %c0_i32_0 = arith.constant 0 : i32
    %c0_i32_1 = arith.constant 0 : i32
    return %arg0, %c0_i32, %c0_i32_0 : i32, i32, i32
  }
  func.func @transform_1(%arg0: i32) -> (i32, i32, i32) {
    %c0_i32 = arith.constant 0 : i32
    %c0_i32_0 = arith.constant 0 : i32
    %c0_i32_1 = arith.constant 0 : i32
    %c0_i32_2 = arith.constant 0 : i32
    return %c0_i32, %c0_i32_0, %c0_i32_1 : i32, i32, i32
  }
  func.func @transform_2(%arg0: i32) -> (i32, i32) {
    %c0_i32 = arith.constant 0 : i32
    %c0_i32_0 = arith.constant 0 : i32
    %c0_i32_1 = arith.constant 0 : i32
    return %c0_i32, %c0_i32_0 : i32, i32
  }
  func.func @transform_3(%arg0: i32) -> (i32, i32, i32) {
    %c0_i32 = arith.constant 0 : i32
    %c0_i32_0 = arith.constant 0 : i32
    %c0_i32_1 = arith.constant 0 : i32
    %c0_i32_2 = arith.constant 0 : i32
    return %c0_i32, %c0_i32_0, %c0_i32_1 : i32, i32, i32
  }
  func.func @transform_4(%arg0: i32) -> (i32, i32) {
    %c0_i32 = arith.constant 0 : i32
    %c0_i32_0 = arith.constant 0 : i32
    %c0_i32_1 = arith.constant 0 : i32
    return %c0_i32, %c0_i32_0 : i32, i32
  }
  func.func @transform_5(%arg0: i32) -> (i32, i32, i32) {
    %c0_i32 = arith.constant 0 : i32
    %c0_i32_0 = arith.constant 0 : i32
    %c0_i32_1 = arith.constant 0 : i32
    return %arg0, %c0_i32, %c0_i32_0 : i32, i32, i32
  }
}

</mosaic_0001>

<bundles_post_ra>
// kernel: tpu_custom_call.1
= control target key start
LH: loop header
LB: loop body
LE: loop exit
PB: predicated region body
PF: predicated region fallthrough
CT: control target
= control target key end

     0   :  { %10 = vsyncpa [#allocation4], 0  ;;  %s1797_s0 = inlined_call_operand.vmem [shape: f32[2,18,72], index: 0, kind: input, shape index: {}]   ;;  %s1798_s1 = inlined_call_operand.hbm [shape: f32[3,72,128], index: 1, kind: input, shape index: {}]   ;;  %s1799_s2 = inlined_call_operand.vmem [shape: f32[1,128], index: 2, kind: input, shape index: {}]   ;;  %s1800_s3 = inlined_call_operand.hbm [shape: f32[3,128,128], index: 3, kind: input, shape index: {}]   ;;  %s1801_s4 = inlined_call_operand.vmem [shape: f32[1,128], index: 4, kind: input, shape index: {}]   ;;  %s1802_s5 = inlined_call_operand.hbm [shape: f32[2,16,128], index: 5, kind: output, shape index: {}]  }
   0x1   :  { %11 = vsyncpa [#allocation7], 0 }
   0x2   :  { %12 = vsyncpa [#allocation5], 0 }
   0x3   :  { %14 = vsyncpa [#allocation5 + $0x1], 0  ;;  %s1602_s18 = smov 0   ;;  %s1604_s19 = smov 0  }
   0x4   :  { %s1606_s20 = smov 0   ;;  %s1608_s21 = smov 0  }
   0x5 LB: > { %s1623_s22 = sadd.s32 4294967295, %s1562_s21   ;;  %s939_s23 = sadd.s32 4294967294, %s1562_s21   ;;  %s1562_s21 = sphi %s1608_s21, %s1820_s21   ;;  %s1558_s20 = sphi %s1606_s20, %s1819_s20   ;;  %s1554_s19 = sphi %s1604_s19, %s1818_s19   ;;  %s1550_s18 = sphi %s1602_s18, %s1817_s18  }
   0x6   : > { %s1627_s24 = sadd.s32 1, %s1562_s21   ;;  %s137_s25 = sadd.s32 1, %s1558_s20 }
   0x7   : > { %s134_s26 = ssub.s32 %s1562_s21, %s1627_s24  ;;  %p147_p0 = scmp.ne.s32.totalorder %s1558_s20, %s1554_s19 }
   0x8   : > { %p135_p1 = scmp.eq.s32.totalorder %s134_s26, 0  ;;  %p148_p2 = scmp.eq.s32.totalorder %s1623_s22, 1 }
   0x9   : > { %p153_p3 = scmp.ne.s32.totalorder %s1554_s19, %s1550_s18  ;;  %p154_p4 = scmp.eq.s32.totalorder %s939_s23, 1 }
   0xa   : > { %s1638_s27 = scalar_select %p135_p1, %s1558_s20, %s137_s25  }
   0xb   : > { %p1640_p5 = por %p148_p2, %p147_p0  ;;  %p1644_p6 = por %p154_p4, %p153_p3 }
   0xc   : > { %p940_p7 = scmp.ge.s32.totalorder %s1562_s21, 1  ;;  %p161_p8 = scmp.lt.s32.totalorder %s1562_s21, 3 }
   0xd   : > { %s1806_s28 = scalar_select %p1640_p5, 1, 0 }
   0xe   : > { %s1807_s29 = scalar_select %p1644_p6, 1, 0 }
   0xf   : > { %p1803_p9 = scmp.eq.s32.totalorder %s1623_s22, 0  ;;  %p1651_p10 = pnand %p940_p7, %p161_p8 }
  0x10   : > { %s1564_s6 = smov [#allocation3]   ;;  %s1565_s9 = smov [#allocation6]  }
  0x11   : > { %s1808_s30 = scalar_select %p1651_p10, 1, 0 }
  0x12   : > { %s173_s7 = sshll.u32 %s1564_s6, 4  ;;  %p1381_p11 = pneg %p1651_p10  ;;  %s174_s7 = int_to_ptr.vmem [resolvable:$true] %s173_s7 }
  0x13   : > { %s189_s10 = sshll.u32 %s1565_s9, 4  ;;  %s1436_s13 = scalar_lea.hbm %s1798_s1, 3456  ;;  %s1663_s10 = int_to_ptr.vmem [resolvable:$true] %s189_s10 }
  0x14   : > { %p1659_p12 = pnand %p1803_p9, %p1381_p11  ;;  %p1437_p13 = scmp.ne.s32.totalorder %s1798_s1, %s1436_s13 }
  0x15   : > { %p1443_p3 = scmp.lt.u32.totalorder %s1436_s13, %s1798_s1 }
  0x16   : > { %p1438_p0 = pneg %p1659_p12 }
  0x18   : > { %p1439_p1 = pnand %p1438_p0, %p1437_p13 }
  0x1a   : > { %p1440_p2 = pneg %p1439_p1 }
  0x1c   : > { %p1445_p4 = pnand %p1443_p3, %p1440_p2 }
  0x1e   : > { %1448 = shalt.err (!%p1445_p4)
}
  0x1f   : > { %s1449_s23 = scalar_lea.vmem %s174_s7, 3456  ;;  %p1457_p9 = scmp.lt.s32.totalorder %s174_s7, %s174_s7 }
  0x20   : > { %p1450_p7 = scmp.ne.s32.totalorder %s174_s7, %s1449_s23  ;;  %p1458_p6 = scmp.lt.s32.totalorder %s1449_s23, %s1449_s23 }
  0x22   : > { %p1452_p8 = pnand %p1450_p7, %p1438_p0  ;;  %p1459_p5 = por %p1458_p6, %p1457_p9 }
  0x24   : > { %p1453_p11 = pneg %p1452_p8 }
  0x26   : > { %p1460_p10 = pnand %p1459_p5, %p1453_p11 }
  0x28   : > { %1463 = shalt.err (!%p1460_p10)
}
  0x29   : > { %s1566_s25 = smov 128   ;;  %s1567_s26 = smov 8  }
  0x2a   : > { %1384 = dma.hbm_to_vmem [thread:$0]  (!%p1659_p12), %s1798_s1, 3456, %s174_s7, [#allocation4], %s1566_s25, %s1566_s25, %s1567_s26  }
  0x2b   : > { %s1464_s13 = scalar_lea.hbm %s1800_s3, 6144 }
  0x2c   : > { %p1465_p13 = scmp.ne.s32.totalorder %s1800_s3, %s1464_s13  ;;  %p1471_p9 = scmp.lt.u32.totalorder %s1464_s13, %s1800_s3 }
  0x2e   : > { %p1467_p5 = pnand %p1465_p13, %p1438_p0 }
  0x30   : > { %p1468_p6 = pneg %p1467_p5 }
  0x32   : > { %p1473_p10 = pnand %p1471_p9, %p1468_p6 }
  0x34   : > { %1476 = shalt.err (!%p1473_p10)
}
  0x35   : > { %s1477_s7 = scalar_lea.vmem %s1663_s10, 6144  ;;  %p1485_p4 = scmp.lt.s32.totalorder %s1663_s10, %s1663_s10 }
  0x36   : > { %p1478_p1 = scmp.ne.s32.totalorder %s1663_s10, %s1477_s7  ;;  %p1486_p7 = scmp.lt.s32.totalorder %s1477_s7, %s1477_s7 }
  0x38   : > { %p1480_p2 = pnand %p1478_p1, %p1438_p0  ;;  %p1487_p8 = por %p1486_p7, %p1485_p4 }
  0x3a   : > { %p1481_p3 = pneg %p1480_p2 }
  0x3c   : > { %p1488_p11 = pnand %p1487_p8, %p1481_p3 }
  0x3e   : > { %1491 = shalt.err (!%p1488_p11)
}
  0x3f   : > { %1387 = dma.hbm_to_vmem [thread:$0]  (!%p1659_p12), %s1800_s3, 6144, %s1663_s10, [#allocation7], %s1566_s25, %s1566_s25, %s1567_s26  }
  0x40   : > { %p1810_p13 = scmp.ne.s32.totalorder %s1808_s30, 0 }
  0x41   : > { %p1811_p5 = scmp.eq.s32.totalorder (!%p1810_p13), %s1623_s22, 0 }
  0x42   : > { %216 = sbr.rel (%p1810_p13) target bundleno = 607 (0x25f), region = 40 }
  0x49   : > { %1537 = dma.done.wait (%p1811_p5), [#allocation4], 3456   ;;  %p1812_p0 = pmov %p1811_p5 }
  0x4b   : > { %1539 = vsyncadd (%p1812_p0), [#allocation4], 4294963840  ;;  %p1813_p6 = pmov %p1812_p0 }
  0x4c   : > { %p1814_p9 = pmov %p1812_p0 }
  0x4d   : > { %1541 = dma.done.wait (%p1813_p6), [#allocation7], 6144  }
  0x4e   : > { %1543 = vsyncadd (%p1814_p9), [#allocation7], 4294961152  ;;  %p248_p10 = scmp.lt.s32.totalorder %s1623_s22, 1  ;;  %v255_v0 = vld [vmem:[#allocation3] sm:$0xff]  ;;  %v256_v1 = vld [vmem:[#allocation3 + $0x8] sm:$0xff]  ;;  %vm276_vm0 = vcmask 588800  }
  0x4f   : > { %v257_v2 = vld [vmem:[#allocation3 + $0x10] sm:$0xff]  ;;  %v1234_v3 = vpack.c.bf16 %v256_v1, %v255_v0  ;;  %v258_v4 = vld [vmem:[#allocation3 + $0x18] sm:$0xff]  ;;  %v259_v6 = vld [vmem:[#allocation3 + $0x20] sm:$0xff]  ;;  %s245_s12 = sand.u32 1, %s1554_s19   ;;  %s962_s7 = sshll.u32 %s1623_s22, 8 }
  0x50   : > { %s249_s8 = scalar_select %p248_p10, %s1623_s22, 1  ;;  %v1238_v5 = vpack.c.bf16 %v258_v4, %v257_v2  ;;  %v260_v7 = vld [vmem:[#allocation3 + $0x28] sm:$0xff]  ;;  %v268_v9 = vld [vmem:[#allocation3 + $0x50] sm:$0xff]  ;;  %v269_v14 = vld [vmem:[#allocation3 + $0x58] sm:$0xff] }
  0x51   : > { %1235 = vmatprep.subr.bf16.mxu0 %v1234_v3  ;;  %v267_v8 = vld [vmem:[#allocation3 + $0x48] sm:$0xff]  ;;  %v1242_v12 = vpack.c.bf16 %v260_v7, %v259_v6  ;;  %v261_v13 = vld [vmem:[#allocation3 + $0x30] sm:$0xff]  ;;  %v270_v15 = vld [vmem:[#allocation3 + $0x60] sm:$0xff]  ;;  %s947_s13 = sshll.u32 %s245_s12, 4  ;;  %p1815_p1 = scmp.ne.s32.totalorder %s1806_s28, 0 }
  0x52   : > { %s1370_s10 = smul.u32 24, %s249_s8  ;;  %1237 = vmatpush3.bf16.msra.mxu0 %v1234_v3  ;;  %v1218_v11 = vpack.c.bf16 %v268_v9, %v267_v8  ;;  %v262_v16 = vld [vmem:[#allocation3 + $0x38] sm:$0xff]  ;;  %v1222_v17 = vpack.c.bf16 %v270_v15, %v269_v14  ;;  %v271_v18 = vld [vmem:[#allocation3 + $0x68] sm:$0xff]  ;;  %v272_v19 = vld [vmem:[#allocation3 + $0x70] sm:$0xff]  ;;  %s247_s16 = scalar_lea.vmem [#allocation8], %s947_s13 }
  0x53   : > { %1239 = vmatprep.subr.bf16.mxu0 %v1238_v5  ;;  %v1226_v20 = vpack.c.bf16 %v272_v19, %v271_v18  ;;  %v1246_v21 = vpack.c.bf16 %v262_v16, %v261_v13  ;;  %v273_v22 = vld [vmem:[#allocation3 + $0x78] sm:$0xff]  ;;  %v274_v23 = vld [vmem:[#allocation3 + $0x80] sm:$0xff]  ;;  %v442_v27 = vld [vmem:[#allocation3 + $0x90] sm:$0xff]  ;;  %s855_s17 = sshll.u32 %s247_s16, 4  ;;  %s1754_s8 = scalar_lea.hbm %s1802_s5, %s962_s7  ;;  %s1749_s17 = int_to_ptr.vmem [resolvable:$true] %s855_s17 }
  0x54   : > { %s1727_s26 = scalar_lea.vmem %s1797_s0, %s1370_s10  ;;  %1219 = vmatprep.subr.bf16.mxu1 %v1218_v11  ;;  %v1230_v25 = vpack.c.bf16 %v274_v23, %v273_v22  ;;  %v263_v26 = vld [vmem:[#allocation3 + $0x40] sm:$0xff]  ;;  %v443_v28 = vld [vmem:[#allocation3 + $0x98] sm:$0xff]  ;;  %v445_v30 = vld [vmem:[#allocation3 + $0xa8] sm:$0xff]  ;;  %s1756_s10 = scalar_lea.sflag [#allocation5], %s245_s12 }
  0x55   : > { %v253_v10 = vld [vmem:[%s1727_s26] sm:$0xff]  ;;  %1221 = vmatpush3.bf16.msra.mxu1 %v1218_v11  ;;  %v444_v29 = vld [vmem:[#allocation3 + $0xa0] sm:$0xff]  ;;  %v1250_v31 = vpack.c.bf16 %v443_v28, %v442_v27  ;;  %v549_v33 = vld [vmem:[#allocation6] sm:$0xff]  ;;  %s1492_s22 = scalar_lea.vmem %s1749_s17, 256  ;;  %s1569_s30 = smov [#allocation8]  }
  0x56   : > { %1089 = vmatprep.mubr.msk.f32.mxu0 %vm276_vm0, %v253_v10  ;;  %1241 = vmatpush3.bf16.msra.mxu0 %v1238_v5  ;;  %v264_v24 = vld [vmem:[%s1727_s26 + $0x1] sm:$0xff]  ;;  %v550_v34 = vld [vmem:[#allocation6 + $0x8] sm:$0xff]  ;;  %v1254_v36 = vpack.c.bf16 %v445_v30, %v444_v29  ;;  %v447_v41 = vld [vmem:[#allocation3 + $0xb8] sm:$0xff]  ;;  %p1493_p12 = scmp.ne.s32.totalorder %s1749_s17, %s1492_s22  ;;  %s1496_s25 = sshll.u32 %s1569_s30, 4  ;;  %s1497_s25 = int_to_ptr.vmem [resolvable:$false] %s1496_s25 }
  0x57   : > { %1223 = vmatprep.subr.bf16.mxu1 %v1222_v17  ;;  %1243 = vmatprep.subr.bf16.mxu0 %v1242_v12  ;;  %v275_v32 = vld [vmem:[#allocation3 + $0x88] sm:$0xff]  ;;  %v254_v35 = vld [vmem:[%s1727_s26 + $0x8] sm:$0xff]  ;;  %v1298_v42 = vpack.c.bf16 %v550_v34, %v549_v33  ;;  %v553_v46 = vld [vmem:[#allocation6 + $0x20] sm:$0xff]  ;;  %p1499_p4 = scmp.lt.s32.totalorder %s1749_s17, %s1497_s25 }
  0x58   : > { %1068 = vmatprep.mubr.msk.f32.mxu1 %vm276_vm0, %v264_v24  ;;  %v439_v37 = vld [vmem:[%s1727_s26 + $0x2] sm:$0xff]  ;;  %v554_v47 = vld [vmem:[#allocation6 + $0x28] sm:$0xff]  ;;  %v557_v55 = vld [vmem:[#allocation6 + $0x40] sm:$0xff]  ;;  %p1494_p2 = pnand %p1493_p12, %p1815_p1 }
  0x59   : > { %1225 = vmatpush3.bf16.msra.mxu1 %v1222_v17  ;;  %v551_v38 = vld [vmem:[#allocation6 + $0x10] sm:$0xff]  ;;  %v552_v39 = vld [vmem:[#allocation6 + $0x18] sm:$0xff]  ;;  %v448_v48 = vld [vmem:[#allocation3 + $0xc0] sm:$0xff]  ;;  %v1306_v50 = vpack.c.bf16 %v554_v47, %v553_v46 }
  0x5a   : > { %1245 = vmatpush3.bf16.msra.mxu0 %v1242_v12  ;;  %1227 = vmatprep.subr.bf16.mxu1 %v1226_v20  ;;  %v446_v40 = vld [vmem:[#allocation3 + $0xb0] sm:$0xff]  ;;  %v1302_v44 = vpack.c.bf16 %v552_v39, %v551_v38  ;;  %v449_v49 = vld [vmem:[#allocation3 + $0xc8] sm:$0xff]  ;;  %v558_v56 = vld [vmem:[#allocation6 + $0x48] sm:$0xff]  ;;  %p1495_p3 = pneg %p1494_p2 }
  0x5b   : > { %1247 = vmatprep.subr.bf16.mxu0 %v1246_v21  ;;  %v265_v43 = vld [vmem:[%s1727_s26 + $0x9] sm:$0xff]  ;;  %v1258_v45 = vpack.c.bf16 %v447_v41, %v446_v40  ;;  %v1262_v51 = vpack.c.bf16 %v449_v49, %v448_v48  ;;  %v555_v52 = vld [vmem:[#allocation6 + $0x30] sm:$0xff]  ;;  %v569_v59 = vld [vmem:[#allocation6 + $0x88] sm:$0xff]  ;;  %v1314_v62 = vpack.c.bf16 %v558_v56, %v557_v55 }
  0x5c   : > { %v556_v53 = vld [vmem:[#allocation6 + $0x38] sm:$0xff]  ;;  %v568_v58 = vld [vmem:[#allocation6 + $0x80] sm:$0xff]  ;;  %v570_v60 = vld [vmem:[#allocation6 + $0x90] sm:$0xff] }
  0x5d   : > { %1229 = vmatpush3.bf16.msra.mxu1 %v1226_v20  ;;  %v1310_v54 = vpack.c.bf16 %v556_v53, %v555_v52  ;;  %v450_v57 = vld [vmem:[#allocation3 + $0xd0] sm:$0xff]  ;;  %v1266_v63 = vpack.c.bf16 %v569_v59, %v568_v58  ;;  %v572_v2 = vld [vmem:[#allocation6 + $0xa0] sm:$0xff]  ;;  %v573_v3 = vld [vmem:[#allocation6 + $0xa8] sm:$0xff] }
  0x5e   : > { %1249 = vmatpush3.bf16.msra.mxu0 %v1246_v21  ;;  %1231 = vmatprep.subr.bf16.mxu1 %v1230_v25  ;;  %v571_v61 = vld [vmem:[#allocation6 + $0x98] sm:$0xff]  ;;  %v1274_v4 = vpack.c.bf16 %v573_v3, %v572_v2  ;;  %v574_v5 = vld [vmem:[#allocation6 + $0xb0] sm:$0xff]  ;;  %v576_v8 = vld [vmem:[#allocation6 + $0xc0] sm:$0xff] }
  0x5f   : > { %1087 = vmatprep.subr.mxu0 %v263_v26  ;;  %v440_v0 = vld [vmem:[%s1727_s26 + $0xa] sm:$0xff]  ;;  %v1270_v1 = vpack.c.bf16 %v571_v61, %v570_v60  ;;  %v577_v9 = vld [vmem:[#allocation6 + $0xc8] sm:$0xff]  ;;  %v578_v11 = vld [vmem:[#allocation6 + $0xd0] sm:$0xff]  ;;  %s1498_s26 = scalar_lea.vmem %s1497_s25, 512 }
  0x60   : > { %v575_v6 = vld [vmem:[#allocation6 + $0xb8] sm:$0xff]  ;;  %v1282_v10 = vpack.c.bf16 %v577_v9, %v576_v8  ;;  %v580_v14 = vld [vmem:[#allocation6 + $0xe0] sm:$0xff]  ;;  %v581_v15 = vld [vmem:[#allocation6 + $0xe8] sm:$0xff]  ;;  %p1500_p7 = scmp.lt.s32.totalorder %s1498_s26, %s1492_s22 }
  0x61   : > { %1233 = vmatpush3.bf16.msra.mxu1 %v1230_v25  ;;  %v1278_v7 = vpack.c.bf16 %v575_v6, %v574_v5  ;;  %v579_v12 = vld [vmem:[#allocation6 + $0xd8] sm:$0xff]  ;;  %v1290_v16 = vpack.c.bf16 %v581_v15, %v580_v14  ;;  %v559_v17 = vld [vmem:[#allocation6 + $0x50] sm:$0xff]  ;;  %v561_v23 = vld [vmem:[#allocation6 + $0x60] sm:$0xff] }
  0x62   : > { %1088 = vmatpush3.msra.mxu0 %v263_v26  ;;  %1066 = vmatprep.subr.mxu1 %v275_v32  ;;  %v1286_v13 = vpack.c.bf16 %v579_v12, %v578_v11  ;;  %v560_v18 = vld [vmem:[#allocation6 + $0x58] sm:$0xff]  ;;  %v582_v20 = vld [vmem:[#allocation6 + $0xf0] sm:$0xff]  ;;  %v562_v24 = vld [vmem:[#allocation6 + $0x68] sm:$0xff]  ;;  %v1568_v26 = vmov 0.0   ;;  %p1501_p8 = por %p1500_p7, %p1499_p4 }
  0x63   : > { %1251 = vmatprep.subr.bf16.mxu0 %v1250_v31  ;;  %1090 = vmatmul.mubr.msk.f32.vlgmr.msra.gmra.mrb[0].mxu0 %vm276_vm0, %v254_v35  ;;  %v1318_v19 = vpack.c.bf16 %v560_v18, %v559_v17  ;;  %v583_v21 = vld [vmem:[#allocation6 + $0xf8] sm:$0xff]  ;;  %v1322_v25 = vpack.c.bf16 %v562_v24, %v561_v23  ;;  %543 = vst [vmem:[#allocation2] sm:$0x1] %v1568_v26  ;;  %544 = vst [vmem:[#allocation2 + $0x11] sm:$0x1] %v1568_v26  ;;  %v563_v27 = vld [vmem:[#allocation6 + $0x70] sm:$0xff] }
  0x64   : > { %1253 = vmatpush3.bf16.msra.mxu0 %v1250_v31  ;;  %1110 = vmatprep.mubr.msk.f32.mxu0 %vm276_vm0, %v439_v37  ;;  %v1294_v22 = vpack.c.bf16 %v583_v21, %v582_v20  ;;  %v564_v28 = vld [vmem:[#allocation6 + $0x78] sm:$0xff]  ;;  %v737_v30 = vld [vmem:[#allocation6 + $0x100] sm:$0xff]  ;;  %v738_v31 = vld [vmem:[#allocation6 + $0x108] sm:$0xff]  ;;  %p1502_p11 = pnand %p1501_p8, %p1495_p3 }
  0x65   : > { %1255 = vmatprep.subr.bf16.mxu0 %v1254_v36  ;;  %1067 = vmatpush3.msra.mxu1 %v275_v32  ;;  %v1326_v29 = vpack.c.bf16 %v564_v28, %v563_v27  ;;  %v1330_v32 = vpack.c.bf16 %v738_v31, %v737_v30  ;;  %v741_v47 = vld [vmem:[#allocation6 + $0x120] sm:$0xff]  ;;  %v742_v48 = vld [vmem:[#allocation6 + $0x128] sm:$0xff]  ;;  %v744_v52 = vld [vmem:[#allocation6 + $0x138] sm:$0xff] }
  0x66   : > { %1069 = vmatmul.mubr.msk.f32.vlgmr.msra.gmra.mrb[0].mxu1 %vm276_vm0, %v265_v43  ;;  %1299 = vmatprep.subr.bf16.mxu1 %v1298_v42  ;;  %v740_v43 = vld [vmem:[#allocation6 + $0x118] sm:$0xff]  ;;  %v746_v55 = vld [vmem:[#allocation6 + $0x148] sm:$0xff]  ;;  %v749_v60 = vld [vmem:[#allocation6 + $0x160] sm:$0xff] }
  0x67   : > { %1301 = vmatpush3.bf16.msra.mxu1 %v1298_v42  ;;  %v739_v42 = vld [vmem:[#allocation6 + $0x110] sm:$0xff]  ;;  %v748_v58 = vld [vmem:[#allocation6 + $0x158] sm:$0xff]  ;;  %v750_v61 = vld [vmem:[#allocation6 + $0x168] sm:$0xff] }
  0x68   : > { %1257 = vmatpush3.bf16.msra.mxu0 %v1254_v36  ;;  %1303 = vmatprep.subr.bf16.mxu1 %v1302_v44  ;;  %v955_v36 = vld [vmem:[%s1799_s2] ss:$0 sm:$0xff]  ;;  %v1334_v46 = vpack.c.bf16 %v740_v43, %v739_v42 }
  0x69   : > { %1259 = vmatprep.subr.bf16.mxu0 %v1258_v45  ;;  %v956_v6 = vld [vmem:[%s1801_s4] ss:$0 sm:$0xff] }
  0x6b   : > { %1305 = vmatpush3.bf16.msra.mxu1 %v1302_v44 }
  0x6c   : > { %1261 = vmatpush3.bf16.msra.mxu0 %v1258_v45  ;;  %1307 = vmatprep.subr.bf16.mxu1 %v1306_v50 }
  0x6d   : > { %1263 = vmatprep.subr.bf16.mxu0 %v1262_v51 }
  0x6f   : > { %1309 = vmatpush3.bf16.msra.mxu1 %v1306_v50  ;;  %v1338_v50 = vpack.c.bf16 %v742_v48, %v741_v47 }
  0x70   : > { %1265 = vmatpush3.bf16.msra.mxu0 %v1262_v51  ;;  %1311 = vmatprep.subr.bf16.mxu1 %v1310_v54  ;;  %v743_v51 = vld [vmem:[#allocation6 + $0x130] sm:$0xff] }
  0x71   : > { %1108 = vmatprep.subr.mxu0 %v450_v57  ;;  %v1342_v53 = vpack.c.bf16 %v744_v52, %v743_v51 }
  0x73   : > { %1313 = vmatpush3.bf16.msra.mxu1 %v1310_v54  ;;  %v745_v54 = vld [vmem:[#allocation6 + $0x140] sm:$0xff] }
  0x74   : > { %1109 = vmatpush3.msra.mxu0 %v450_v57  ;;  %1315 = vmatprep.subr.bf16.mxu1 %v1314_v62  ;;  %v1346_v56 = vpack.c.bf16 %v746_v55, %v745_v54  ;;  %v747_v57 = vld [vmem:[#allocation6 + $0x150] sm:$0xff] }
  0x75   : > { %1111 = vmatmul.mubr.msk.f32.vlgmr.msra.gmra.mrb[0].mxu0 %vm276_vm0, %v440_v0  ;;  %1267 = vmatprep.subr.bf16.mxu0 %v1266_v63  ;;  %v1350_v59 = vpack.c.bf16 %v748_v58, %v747_v57  ;;  %v752_v0 = vld [vmem:[#allocation6 + $0x178] sm:$0xff] }
  0x76   : > { %1269 = vmatpush3.bf16.msra.mxu0 %v1266_v63  ;;  %v751_v63 = vld [vmem:[#allocation6 + $0x170] sm:$0xff] }
  0x77   : > { %1271 = vmatprep.subr.bf16.mxu0 %v1270_v1  ;;  %1317 = vmatpush3.bf16.msra.mxu1 %v1314_v62  ;;  %v1354_v62 = vpack.c.bf16 %v750_v61, %v749_v60 }
  0x78   : > { %1319 = vmatprep.subr.bf16.mxu1 %v1318_v19 }
  0x7a   : > { %1273 = vmatpush3.bf16.msra.mxu0 %v1270_v1  ;;  %v1358_v1 = vpack.c.bf16 %v752_v0, %v751_v63 }
  0x7b   : > { %1275 = vmatprep.subr.bf16.mxu0 %v1274_v4  ;;  %1321 = vmatpush3.bf16.msra.mxu1 %v1318_v19 }
  0x7c   : > { %1323 = vmatprep.subr.bf16.mxu1 %v1322_v25 }
  0x7e   : > { %1277 = vmatpush3.bf16.msra.mxu0 %v1274_v4 }
  0x7f   : > { %1279 = vmatprep.subr.bf16.mxu0 %v1278_v7  ;;  %1325 = vmatpush3.bf16.msra.mxu1 %v1322_v25 }
  0x80   : > { %1327 = vmatprep.subr.bf16.mxu1 %v1326_v29 }
  0x82   : > { %1281 = vmatpush3.bf16.msra.mxu0 %v1278_v7 }
  0x83   : > { %1283 = vmatprep.subr.bf16.mxu0 %v1282_v10  ;;  %1329 = vmatpush3.bf16.msra.mxu1 %v1326_v29 }
  0x84   : > { %1331 = vmatprep.subr.bf16.mxu1 %v1330_v32 }
  0x86   : > { %1285 = vmatpush3.bf16.msra.mxu0 %v1282_v10 }
  0x87   : > { %1287 = vmatprep.subr.bf16.mxu0 %v1286_v13 }
  0x8a   : > { %1289 = vmatpush3.bf16.msra.mxu0 %v1286_v13 }
  0x8b   : > { %1291 = vmatprep.subr.bf16.mxu0 %v1290_v16 }
  0x8e   : > { %1293 = vmatpush3.bf16.msra.mxu0 %v1290_v16 }
  0x8f   : > { %1295 = vmatprep.subr.bf16.mxu0 %v1294_v22 }
  0x92   : > { %1297 = vmatpush3.bf16.msra.mxu0 %v1294_v22 }
 0x139   : > { %v1070_v33 = vpop.f32.mrb[0].mxu1 }
 0x13a   : > { %v349_v34 = vpop.f32.mrb[1].mxu1 }
 0x148   : > { %v1112_v35 = vpop.f32.mrb[0].mxu0 }
 0x149   : > { %v1362_v37 = vadd.f32 %v1112_v35, %v1070_v33  ;;  %v523_v38 = vpop.f32.mrb[1].mxu0 }
 0x14a   : > { %v1363_v39 = vadd.f32 %v523_v38, %v349_v34 }
 0x14b   : > { %v542_v40 = vadd.f32 %v1362_v37, %v955_v36 }
 0x14c   : > { %v541_v41 = vadd.f32 %v1363_v39, %v955_v36 }
 0x14d   : > { %546 = vst [vmem:[#allocation2 + $0x9] sm:$0xff] %v542_v40 }
 0x14e   : > { %545 = vst [vmem:[#allocation2 + $0x1] sm:$0xff] %v541_v41  ;;  %1145 = vmatprep.mubr.f32.mxu0 %v541_v41 }
 0x14f   : > { %1146 = vmatmul.mubr.f32.vlgmr.msra.gmra.mrb[2].mxu0 %v542_v40 }
 0x154   : > { %v735_v2 = vld [vmem:[#allocation2 + $0xa] sm:$0xff] }
 0x155   : > { %v547_v44 = vld [vmem:[#allocation2] sm:$0xff]  ;;  %v548_v45 = vld [vmem:[#allocation2 + $0x8] sm:$0xff] }
 0x156   : > { %1180 = vmatprep.mubr.f32.mxu1 %v547_v44  ;;  %v734_v49 = vld [vmem:[#allocation2 + $0x2] sm:$0xff] }
 0x157   : > { %1181 = vmatmul.mubr.f32.vlgmr.msra.gmra.mrb[2].mxu1 %v548_v45 }
 0x158   : > { %1333 = vmatpush3.bf16.msra.mxu1 %v1330_v32  ;;  %1215 = vmatprep.mubr.f32.mxu1 %v734_v49 }
 0x159   : > { %1335 = vmatprep.subr.bf16.mxu1 %v1334_v46 }
 0x15c   : > { %1337 = vmatpush3.bf16.msra.mxu1 %v1334_v46 }
 0x15d   : > { %1339 = vmatprep.subr.bf16.mxu1 %v1338_v50 }
 0x160   : > { %1341 = vmatpush3.bf16.msra.mxu1 %v1338_v50 }
 0x161   : > { %1343 = vmatprep.subr.bf16.mxu1 %v1342_v53 }
 0x164   : > { %1345 = vmatpush3.bf16.msra.mxu1 %v1342_v53 }
 0x165   : > { %1347 = vmatprep.subr.bf16.mxu1 %v1346_v56 }
 0x168   : > { %1349 = vmatpush3.bf16.msra.mxu1 %v1346_v56 }
 0x169   : > { %1351 = vmatprep.subr.bf16.mxu1 %v1350_v59 }
 0x16c   : > { %1353 = vmatpush3.bf16.msra.mxu1 %v1350_v59 }
 0x16d   : > { %1355 = vmatprep.subr.bf16.mxu1 %v1354_v62 }
 0x170   : > { %1357 = vmatpush3.bf16.msra.mxu1 %v1354_v62 }
 0x171   : > { %1359 = vmatprep.subr.bf16.mxu1 %v1358_v1 }
 0x174   : > { %1361 = vmatpush3.bf16.msra.mxu1 %v1358_v1 }
 0x177   : > { %1216 = vmatmul.mubr.f32.vlgmr.msra.gmra.mrb[2].mxu1 %v735_v2 }
 0x222   : > { %v1147_v3 = vpop.f32.mrb[2].mxu0 }
 0x223   : > { %v650_v4 = vpop.f32.mrb[3].mxu0 }
 0x24a   : > { %v1217_v5 = vpop.f32.mrb[2].mxu1 }
 0x24b   : > { %v1364_v7 = vadd.f32 %v1217_v5, %v1147_v3  ;;  %v819_v8 = vpop.f32.mrb[3].mxu1 }
 0x24c   : > { %v1365_v9 = vadd.f32 %v819_v8, %v650_v4 }
 0x24d   : > { %v838_v10 = vadd.f32 %v1364_v7, %v956_v6 }
 0x24e   : > { %v837_v11 = vadd.f32 %v1365_v9, %v956_v6 }
 0x24f   : > { %840 = vst [vmem:[%s247_s16 + $0x8] sm:$0xff] %v838_v10 }
 0x250   : > { %839 = vst [vmem:[%s247_s16] sm:$0xff] %v837_v11 }
 0x251   : > { %1505 = shalt.err (!%p1502_p11)
}
 0x252   : > { %s1506_s9 = scalar_lea.hbm %s1754_s8, 256  ;;  %s1510_s13 = scalar_lea.hbm %s1802_s5, 512 }
 0x253   : > { %p1507_p13 = scmp.ne.s32.totalorder %s1754_s8, %s1506_s9  ;;  %p1511_p6 = scmp.lt.u32.totalorder %s1754_s8, %s1802_s5 }
 0x254   : > { %p1512_p9 = scmp.lt.u32.totalorder %s1510_s13, %s1506_s9  ;;  %p1514_p12 = scmp.lt.u32.totalorder %s1506_s9, %s1754_s8 }
 0x255   : > { %p1508_p5 = pnand %p1507_p13, %p1815_p1 }
 0x256   : > { %p1513_p10 = por %p1512_p9, %p1511_p6 }
 0x257   : > { %p1509_p0 = pneg %p1508_p5 }
 0x258   : > { %p1515_p2 = por %p1514_p12, %p1513_p10 }
 0x25a   : > { %p1516_p3 = pnand %p1515_p2, %p1509_p0 }
 0x25c   : > { %1519 = shalt.err (!%p1516_p3)
}
 0x25d   : > { %s1570_s16 = smov 128   ;;  %s1571_s7 = smov 8  }
 0x25e   : > { %1379 = dma.vmem_to_hbm [thread:$0]  (%p1815_p1), %s1749_s17, 256, %s1754_s8, %s1756_s10, %s1570_s16, %s1570_s16, %s1571_s7  }
 0x25f PF: > { %p1396_p4 = scmp.ge.s32.totalorder %s1562_s21, 2  ;;  %s870_s23 = sand.u32 1, %s1550_s18  }
 0x260   : > { %p1816_p7 = scmp.ne.s32.totalorder %s1807_s29, 0  ;;  %s871_s6 = scalar_lea.sflag [#allocation5], %s870_s23 }
 0x262   : > { %p1389_p8 = pnand %p1396_p4, %p1816_p7 }
 0x264   : > { %1545 = dma.done.wait (!%p1389_p8), %s871_s6, 256  }
 0x265   : > { %1547 = vsyncadd (!%p1389_p8), %s871_s6, 4294967040  ;;  %p17_p11 = scmp.ge.s32.totalorder %s1627_s24, 4   ;;  %s1817_s18 = smov %s1554_s19 }
 0x266   : > { %s1818_s19 = smov %s1558_s20  ;;  %s1819_s20 = smov %s1638_s27 }
 0x267   : > { %s1820_s21 = smov %s1627_s24  ;;  %19 = sbr.rel (!%p17_p11) target bundleno = 5 (0x5), region = 88 }
 0x26e   :  { %876 = vsyncpa [#allocation4], 1 }
 0x26f   :  { %878 = vsyncpa [#allocation4 + $0x1], 1 }
 0x270   :  { %879 = vsyncpa [#allocation7], 1 }
 0x271   :  { %880 = vsyncpa [#allocation5], 1 }
 0x272   :  { %882 = vsyncpa [#allocation5 + $0x1], 1 }

</bundles_post_ra>
